<compile_context>
chip_gen: v5e
topology: v5e:2x2
jax: 0.10.0
libtpu: 0.0.40
codegen_flags: <defaults>
</compile_context>

<pallas_src>
import functools

import jax
import jax.numpy as jnp
from jax import lax
from jax.experimental import pallas as pl
from jax.experimental.pallas import tpu as pltpu

LANE = 128  # lane width of a vreg


def _sublane(dtype):
    """Dtype-aware sublane floor: 8 for f32, 16 for bf16/f16, 32 for int8/fp8."""
    itemsize = jnp.dtype(dtype).itemsize
    return max(8, 32 // max(itemsize, 1))


@functools.lru_cache(maxsize=None)
def _budgets():
    """(per-block byte target, vmem_limit_bytes) tuned per TPU generation."""
    try:
        cap = int(getattr(pltpu.get_tpu_info(), "vmem_capacity_bytes"))
    except Exception:  # unknown backend -> conservative defaults
        return 4 * 1024 * 1024, 32 * 1024 * 1024
    if cap <= 80 * 1024 * 1024:  # v7x: 64 MiB per TensorCore
        return 3 * 1024 * 1024, 40 * 1024 * 1024
    return 12 * 1024 * 1024, 96 * 1024 * 1024  # v5e / v6e: 128 MiB


def _slab_tile_f(B, F, dtype, block_bytes, *, fused):
    """Feature tile for the whole-batch (slab) fit path, or None if it can't fit."""
    item = jnp.dtype(dtype).itemsize
    # x block double-buffered + f32 temps (+ fused y block + its temp)
    per_col = B * (2 * item + 12) + (B * (2 * item + 8) if fused else 0)
    per_col = max(per_col, 1)
    if F <= LANE:
        return F if F * per_col <= block_bytes else None
    max_cols = block_bytes // per_col
    if max_cols < LANE:
        return None
    # cap tile_f so large-F problems keep >= several grid steps (v7x 2-TC sharding)
    return min((max_cols // LANE) * LANE, (F // LANE) * LANE, 2048)


def _stream_tiles(B, F, dtype, block_bytes):
    """(tile_b, tile_f) for the batch-streaming fit path (VMEM independent of B)."""
    item = jnp.dtype(dtype).itemsize
    sub = _sublane(dtype)
    tile_f = F if F <= LANE else min((F // LANE) * LANE, 1024)
    if B <= sub:
        return B, tile_f
    rows = block_bytes // max(tile_f * (2 * item + 8), 1)
    tile_b = max(sub, min((B // sub) * sub, (rows // sub) * sub, 4096))
    return tile_b, tile_f


def _elementwise_tiles(B, F, dtype, block_bytes):
    """(tile_b, tile_f) for the forward / inverse elementwise passes."""
    item = jnp.dtype(dtype).itemsize
    sub = _sublane(dtype)
    tile_f = F if F <= LANE else min((F // LANE) * LANE, 2048)
    if B <= sub:
        return B, tile_f
    rows = block_bytes // max(4 * tile_f * item, 1)  # x + y, double-buffered
    tile_b = max(sub, min((B // sub) * sub, (rows // sub) * sub, 4096))
    return tile_b, tile_f


# ---------------------------------------------------------------------------
# Kernels
# ---------------------------------------------------------------------------
def _fit_slab_kernel(x_ref, mean_ref, std_ref, inv_ref, *, eps, inv_denom):
    """Whole-batch fit: mean / std(clamped) / 1/std per feature column."""
    x = x_ref[...].astype(jnp.float32)
    mean = jnp.mean(x, axis=0, keepdims=True)
    diff = x - mean
    var = jnp.sum(diff * diff, axis=0, keepdims=True) * jnp.float32(inv_denom)
    std = jnp.maximum(jnp.sqrt(var), jnp.float32(eps))
    inv = 1.0 / std  # 1-row reciprocal only
    mean_ref[...] = mean.astype(mean_ref.dtype)
    std_ref[...] = std.astype(std_ref.dtype)
    inv_ref[...] = inv.astype(inv_ref.dtype)


def _fit_transform_kernel(x_ref, mean_ref, std_ref, inv_ref, y_ref, *, eps, inv_denom):
    """Fused fit + forward: one HBM read of x yields stats and (x - mean)/std."""
    x = x_ref[...].astype(jnp.float32)
    mean = jnp.mean(x, axis=0, keepdims=True)
    diff = x - mean
    var = jnp.sum(diff * diff, axis=0, keepdims=True) * jnp.float32(inv_denom)
    std = jnp.maximum(jnp.sqrt(var), jnp.float32(eps))
    inv = 1.0 / std
    mean_ref[...] = mean.astype(mean_ref.dtype)
    std_ref[...] = std.astype(std_ref.dtype)
    inv_ref[...] = inv.astype(inv_ref.dtype)
    y_ref[...] = (diff * inv).astype(y_ref.dtype)


def _fit_stream_kernel(x_ref, mean_ref, std_ref, inv_ref, sum_ref, ssq_ref,
                       *, eps, inv_denom, inv_total, total_b, tile_b):
    """Batch-streaming fit: accumulate sum / sum-of-squares in f32 scratch."""
    i = pl.program_id(1)  # batch block index (last, "arbitrary" grid axis)

    @pl.when(i == 0)
    def _():
        sum_ref[...] = jnp.zeros_like(sum_ref)
        ssq_ref[...] = jnp.zeros_like(ssq_ref)

    x = x_ref[...].astype(jnp.float32)
    if total_b % tile_b != 0:  # mask garbage rows in the ragged last batch block
        row = lax.broadcasted_iota(jnp.int32, x.shape, 0) + i * tile_b
        x = jnp.where(row < total_b, x, 0.0)
    sum_ref[...] += jnp.sum(x, axis=0, keepdims=True)
    ssq_ref[...] += jnp.sum(x * x, axis=0, keepdims=True)

    @pl.when(i == pl.num_programs(1) - 1)
    def _():
        s = sum_ref[...]
        mean = s * jnp.float32(inv_total)
        var = (ssq_ref[...] - s * mean) * jnp.float32(inv_denom)
        var = jnp.maximum(var, 0.0)
        std = jnp.maximum(jnp.sqrt(var), jnp.float32(eps))
        mean_ref[...] = mean.astype(mean_ref.dtype)
        std_ref[...] = std.astype(std_ref.dtype)
        inv_ref[...] = (1.0 / std).astype(inv_ref.dtype)


def _forward_kernel(x_ref, mean_ref, inv_ref, y_ref):
    """forward(x) = (x - mean) * (1/std); computed in the native dtype."""
    y_ref[...] = ((x_ref[...] - mean_ref[...]) * inv_ref[...]).astype(y_ref.dtype)


def _inverse_kernel(z_ref, mean_ref, std_ref, x_ref):
    """inverse(z) = z * std + mean."""
    x_ref[...] = (z_ref[...] * std_ref[...] + mean_ref[...]).astype(x_ref.dtype)


# ---------------------------------------------------------------------------
# pallas_call wrappers (all operate directly on (B, F) / (1, F) arrays)
# ---------------------------------------------------------------------------
def _stat_out(F, dtype, n=3):
    return tuple(jax.ShapeDtypeStruct((1, F), dtype) for _ in range(n))


def std_scaler_fit(x2d, *, eps=1e-12, unbiased=False, force_stream=False):
    """StdScaler.fit for dim=(0,). Returns (mean, std, inv_std), each (1, F)."""
    B, F = x2d.shape
    block_bytes, vmem_limit = _budgets()
    denom = (B - 1) if unbiased else B
    inv_denom = (1.0 / denom) if denom > 0 else float("nan")  # torch: NaN std for n=1 unbiased
    inv_total = 1.0 / B

    tile_f = None if force_stream else _slab_tile_f(B, F, x2d.dtype, block_bytes, fused=False)
    if tile_f is not None:
        kernel = functools.partial(_fit_slab_kernel, eps=eps, inv_denom=inv_denom)
        return pl.pallas_call(
            kernel,
            out_shape=_stat_out(F, x2d.dtype),
            grid=(pl.cdiv(F, tile_f),),
            in_specs=[pl.BlockSpec((B, tile_f), lambda j: (0, j))],
            out_specs=tuple(pl.BlockSpec((1, tile_f), lambda j: (0, j)) for _ in range(3)),
            compiler_params=pltpu.CompilerParams(
                dimension_semantics=("parallel",),
                vmem_limit_bytes=vmem_limit,
            ),
        )(x2d)

    # Streaming path: VMEM footprint independent of B.
    tile_b, tile_f = _stream_tiles(B, F, x2d.dtype, block_bytes)
    kernel = functools.partial(
        _fit_stream_kernel, eps=eps, inv_denom=inv_denom, inv_total=inv_total,
        total_b=B, tile_b=tile_b)
    return pl.pallas_call(
        kernel,
        out_shape=_stat_out(F, x2d.dtype),
        grid=(pl.cdiv(F, tile_f), pl.cdiv(B, tile_b)),
        in_specs=[pl.BlockSpec((tile_b, tile_f), lambda j, i: (i, j))],
        out_specs=tuple(pl.BlockSpec((1, tile_f), lambda j, i: (0, j)) for _ in range(3)),
        scratch_shapes=[pltpu.VMEM((1, tile_f), jnp.float32),
                        pltpu.VMEM((1, tile_f), jnp.float32)],
        compiler_params=pltpu.CompilerParams(
            dimension_semantics=("parallel", "arbitrary"),
            vmem_limit_bytes=vmem_limit,
        ),
    )(x2d)


def _apply_elementwise(kernel, x2d, stat_a, stat_b):
    """Tiled elementwise pass (x, stat_a, stat_b) -> y, no padding / slicing."""
    B, F = x2d.shape
    block_bytes, vmem_limit = _budgets()
    tile_b, tile_f = _elementwise_tiles(B, F, x2d.dtype, block_bytes)
    return pl.pallas_call(
        kernel,
        out_shape=jax.ShapeDtypeStruct((B, F), x2d.dtype),
        grid=(pl.cdiv(B, tile_b), pl.cdiv(F, tile_f)),
        in_specs=[
            pl.BlockSpec((tile_b, tile_f), lambda i, j: (i, j)),
            pl.BlockSpec((1, tile_f), lambda i, j: (0, j)),
            pl.BlockSpec((1, tile_f), lambda i, j: (0, j)),
        ],
        out_specs=pl.BlockSpec((tile_b, tile_f), lambda i, j: (i, j)),
        compiler_params=pltpu.CompilerParams(
            dimension_semantics=("parallel", "parallel"),
            vmem_limit_bytes=vmem_limit,
        ),
    )(x2d, stat_a, stat_b)


def std_scaler_fit_transform(x2d, *, eps=1e-12, unbiased=False):
    """Fused fit + forward. Returns (mean, std, inv_std, y)."""
    B, F = x2d.shape
    block_bytes, vmem_limit = _budgets()
    denom = (B - 1) if unbiased else B
    inv_denom = (1.0 / denom) if denom > 0 else float("nan")

    tile_f = _slab_tile_f(B, F, x2d.dtype, block_bytes, fused=True)
    if tile_f is None:
        # Batch too large for the fused single pass: stream the stats, then a
        # separate elementwise pass (two HBM reads of x instead of one).
        mean, std, inv = std_scaler_fit(x2d, eps=eps, unbiased=unbiased)
        y = _apply_elementwise(_forward_kernel, x2d, mean, inv)
        return mean, std, inv, y

    kernel = functools.partial(_fit_transform_kernel, eps=eps, inv_denom=inv_denom)
    mean, std, inv, y = pl.pallas_call(
        kernel,
        out_shape=_stat_out(F, x2d.dtype) + (jax.ShapeDtypeStruct((B, F), x2d.dtype),),
        grid=(pl.cdiv(F, tile_f),),
        in_specs=[pl.BlockSpec((B, tile_f), lambda j: (0, j))],
        out_specs=tuple(pl.BlockSpec((1, tile_f), lambda j: (0, j)) for _ in range(3))
        + (pl.BlockSpec((B, tile_f), lambda j: (0, j)),),
        compiler_params=pltpu.CompilerParams(
            dimension_semantics=("parallel",),
            vmem_limit_bytes=vmem_limit,
        ),
    )(x2d)
    return mean, std, inv, y


# ---------------------------------------------------------------------------
# Module-like wrapper (mirrors mwlab.nn.scalers.StdScaler, dim=0)
# ---------------------------------------------------------------------------
class StdScalerPallas:
    DEFAULT_EPS = 1e-12

    def __init__(self, eps=None, unbiased=False):
        self.eps = float(eps) if eps is not None else self.DEFAULT_EPS
        self.unbiased = bool(unbiased)
        # Buffer init as in the torch module: mean=0.0, std=1.0 scalars.
        self.mean = jnp.asarray(0.0, dtype=jnp.float32)
        self.std = jnp.asarray(1.0, dtype=jnp.float32)
        self.inv_std = None  # cached 1/std (set by fit / fit_transform)

    def fit(self, x, force_stream=False):
        B = x.shape[0]
        mean, std, inv = std_scaler_fit(
            x.reshape(B, -1), eps=self.eps, unbiased=self.unbiased,
            force_stream=force_stream)
        stat_shape = (1,) + x.shape[1:]
        self.mean = mean.reshape(stat_shape)
        self.std = std.reshape(stat_shape)
        self.inv_std = inv.reshape(stat_shape)
        return self

    def fit_transform(self, x):
        B = x.shape[0]
        mean, std, inv, y = std_scaler_fit_transform(
            x.reshape(B, -1), eps=self.eps, unbiased=self.unbiased)
        stat_shape = (1,) + x.shape[1:]
        self.mean = mean.reshape(stat_shape)
        self.std = std.reshape(stat_shape)
        self.inv_std = inv.reshape(stat_shape)
        return y.reshape(x.shape)

    def _stats2d(self, x):
        shape = (1,) + x.shape[1:]
        m = jnp.broadcast_to(self.mean, shape).reshape(1, -1).astype(x.dtype)
        s = jnp.broadcast_to(self.std, shape).reshape(1, -1).astype(x.dtype)
        if self.inv_std is not None and self.inv_std.shape == shape:
            inv = self.inv_std.reshape(1, -1).astype(x.dtype)
        else:
            inv = (1.0 / s.astype(jnp.float32)).astype(x.dtype)
        return m, s, inv

    def forward(self, x):
        B = x.shape[0]
        m, _, inv = self._stats2d(x)
        return _apply_elementwise(_forward_kernel, x.reshape(B, -1), m, inv).reshape(x.shape)

    def inverse(self, z):
        B = z.shape[0]
        m, s, _ = self._stats2d(z)
        return _apply_elementwise(_inverse_kernel, z.reshape(B, -1), m, s).reshape(z.shape)


# ---------------------------------------------------------------------------
# Main
# ---------------------------------------------------------------------------
if __name__ == "__main__":
    # --- lane-aligned case (B=2, C=4, H=16, W=16 -> F=1024) ------------------
    key = jax.random.PRNGKey(0)
    B, C, H, W = 2, 4, 16, 16
    x = jax.random.normal(key, (B, C, H, W), dtype=jnp.float32) * 3.0 + 1.5

    scaler = StdScalerPallas(eps=1e-12, unbiased=False)
    scaler.fit(x)
    y = scaler.forward(x)
    y_fused = StdScalerPallas(eps=1e-12, unbiased=False).fit_transform(x)
    z = scaler.inverse(y)
    jax.block_until_ready((y, y_fused, z))

    mean_ref = jnp.mean(x, axis=0, keepdims=True)
    std_ref = jnp.maximum(
        jnp.sqrt(jnp.mean((x - mean_ref) ** 2, axis=0, keepdims=True)), 1e-12)
    y_ref = (x - mean_ref) / std_ref

    assert y.shape == x.shape and y.dtype == x.dtype
    assert jnp.allclose(scaler.mean, mean_ref, rtol=1e-5, atol=1e-5)
    assert jnp.allclose(scaler.std, std_ref, rtol=1e-5, atol=1e-5)
    assert jnp.allclose(y, y_ref, rtol=1e-5, atol=1e-5)
    assert jnp.allclose(y_fused, y_ref, rtol=1e-5, atol=1e-5)
    assert jnp.allclose(z, x, rtol=1e-4, atol=1e-4)

    # --- ragged case (F % 128 != 0, B % 8 != 0) + streaming fit --------------
    key2 = jax.random.PRNGKey(1)
    B2, C2, H2, W2 = 60, 5, 9, 9          # F = 405 (ragged last feature block)
    x2 = jax.random.normal(key2, (B2, C2, H2, W2), dtype=jnp.float32) * 2.0 - 0.7

    s2 = StdScalerPallas(eps=1e-12, unbiased=False).fit(x2, force_stream=True)
    y2 = s2.forward(x2)
    jax.block_until_ready(y2)

    m2_ref = jnp.mean(x2, axis=0, keepdims=True)
    sd2_ref = jnp.maximum(
        jnp.sqrt(jnp.mean((x2 - m2_ref) ** 2, axis=0, keepdims=True)), 1e-12)
    y2_ref = (x2 - m2_ref) / sd2_ref
    assert jnp.allclose(s2.mean, m2_ref, rtol=1e-4, atol=1e-4)
    assert jnp.allclose(s2.std, sd2_ref, rtol=1e-4, atol=1e-4)
    assert jnp.allclose(y2, y2_ref, rtol=1e-3, atol=1e-4)

    print("KERNEL_OK")
</pallas_src>

<mosaic_0001>
module attributes {stable_mosaic.version = 11 : i64} {
  func.func @_fit_slab_kernel(%arg0: i32, %arg1: memref<2x1024xf32, #tpu.memory_space<vmem>>, %arg2: memref<1x1024xf32, #tpu.memory_space<vmem>>, %arg3: memref<1x1024xf32, #tpu.memory_space<vmem>>, %arg4: memref<1x1024xf32, #tpu.memory_space<vmem>>) attributes {dimension_semantics = [#tpu.dimension_semantics<parallel>], iteration_bounds = array<i64: 1>, scalar_prefetch = 0 : i64, scratch_operands = 0 : i64, tpu.core_type = #tpu.core_type<tc>, window_params = [{transform_indices = @transform_0, window_bounds = array<i64: 2, 1024>}, {transform_indices = @transform_1, window_bounds = array<i64: 1, 1024>}, {transform_indices = @transform_2, window_bounds = array<i64: 1, 1024>}, {transform_indices = @transform_3, window_bounds = array<i64: 1, 1024>}]} {
    %c0 = arith.constant 0 : index
    %c0_0 = arith.constant 0 : index
    %0 = vector.load %arg1[%c0, %c0_0] : memref<2x1024xf32, #tpu.memory_space<vmem>>, vector<2x1024xf32>
    %cst = arith.constant dense<0.000000e+00> : vector<1024xf32>
    %1 = vector.multi_reduction <add>, %0, %cst [0] : vector<2x1024xf32> to vector<1024xf32>
    %2 = vector.shape_cast %1 : vector<1024xf32> to vector<1x1024xf32>
    %cst_1 = arith.constant 2.000000e+00 : f32
    %3 = vector.broadcast %cst_1 : f32 to vector<1x1024xf32>
    %4 = arith.divf %2, %3 : vector<1x1024xf32>
    %5 = vector.broadcast %4 : vector<1x1024xf32> to vector<2x1024xf32>
    %6 = arith.subf %0, %5 : vector<2x1024xf32>
    %7 = arith.mulf %6, %6 : vector<2x1024xf32>
    %cst_2 = arith.constant dense<0.000000e+00> : vector<1024xf32>
    %8 = vector.multi_reduction <add>, %7, %cst_2 [0] : vector<2x1024xf32> to vector<1024xf32>
    %9 = vector.shape_cast %8 : vector<1024xf32> to vector<1x1024xf32>
    %cst_3 = arith.constant 5.000000e-01 : f32
    %10 = vector.broadcast %cst_3 : f32 to vector<1x1024xf32>
    %11 = arith.mulf %9, %10 : vector<1x1024xf32>
    %12 = math.sqrt %11 : vector<1x1024xf32>
    %cst_4 = arith.constant 9.99999996E-13 : f32
    %13 = vector.broadcast %cst_4 : f32 to vector<1x1024xf32>
    %14 = arith.maximumf %12, %13 : vector<1x1024xf32>
    %cst_5 = arith.constant 1.000000e+00 : f32
    %15 = vector.broadcast %cst_5 : f32 to vector<1x1024xf32>
    %16 = arith.divf %15, %14 : vector<1x1024xf32>
    %c0_6 = arith.constant 0 : index
    %c0_7 = arith.constant 0 : index
    %17 = vector.load %arg2[%c0_6, %c0_7] : memref<1x1024xf32, #tpu.memory_space<vmem>>, vector<1x1024xf32>
    tpu.vector_store %arg2[%c0_6, %c0_7], %4 {strides = array<i32>} : memref<1x1024xf32, #tpu.memory_space<vmem>>, vector<1x1024xf32>,
    %c0_8 = arith.constant 0 : index
    %c0_9 = arith.constant 0 : index
    %18 = vector.load %arg3[%c0_8, %c0_9] : memref<1x1024xf32, #tpu.memory_space<vmem>>, vector<1x1024xf32>
    tpu.vector_store %arg3[%c0_8, %c0_9], %14 {strides = array<i32>} : memref<1x1024xf32, #tpu.memory_space<vmem>>, vector<1x1024xf32>,
    %c0_10 = arith.constant 0 : index
    %c0_11 = arith.constant 0 : index
    %19 = vector.load %arg4[%c0_10, %c0_11] : memref<1x1024xf32, #tpu.memory_space<vmem>>, vector<1x1024xf32>
    tpu.vector_store %arg4[%c0_10, %c0_11], %16 {strides = array<i32>} : memref<1x1024xf32, #tpu.memory_space<vmem>>, vector<1x1024xf32>,
    return
  }
  func.func @transform_0(%arg0: i32) -> (i32, i32) {
    %c0_i32 = arith.constant 0 : i32
    %c0_i32_0 = arith.constant 0 : i32
    return %c0_i32, %arg0 : i32, i32
  }
  func.func @transform_1(%arg0: i32) -> (i32, i32) {
    %c0_i32 = arith.constant 0 : i32
    %c0_i32_0 = arith.constant 0 : i32
    return %c0_i32, %arg0 : i32, i32
  }
  func.func @transform_2(%arg0: i32) -> (i32, i32) {
    %c0_i32 = arith.constant 0 : i32
    %c0_i32_0 = arith.constant 0 : i32
    return %c0_i32, %arg0 : i32, i32
  }
  func.func @transform_3(%arg0: i32) -> (i32, i32) {
    %c0_i32 = arith.constant 0 : i32
    %c0_i32_0 = arith.constant 0 : i32
    return %c0_i32, %arg0 : i32, i32
  }
}

</mosaic_0001>

<bundles_post_ra>
// kernel: tpu_custom_call.1
= control target key start
LH: loop header
LB: loop body
LE: loop exit
PB: predicated region body
PF: predicated region fallthrough
CT: control target
= control target key end

     0   :  { %9 = vsyncpa [#allocation3], 0  ;;  %s1130_s0 = inlined_call_operand.hbm [shape: f32[2,1024], index: 0, kind: input, shape index: {}]   ;;  %s1131_s1 = inlined_call_operand.hbm [shape: f32[1,1024], index: 1, kind: output, shape index: {0}]   ;;  %s1132_s2 = inlined_call_operand.hbm [shape: f32[1,1024], index: 2, kind: output, shape index: {1}]   ;;  %s1133_s3 = inlined_call_operand.hbm [shape: f32[1,1024], index: 3, kind: output, shape index: {2}]  }
   0x1   :  { %10 = vsyncpa [#allocation4], 0 }
   0x2   :  { %11 = vsyncpa [#allocation7], 0  ;;  %s17_s14 = sshll.u32 %s1130_s0, 4  ;;  %s716_s15 = smov [#allocation2]   ;;  %s18_s14 = int_to_ptr.hbm [resolvable:$true] %s17_s14 }
   0x3   :  { %s19_s16 = sshll.u32 %s716_s15, 4  ;;  %s20_s16 = int_to_ptr.vmem [resolvable:$true] %s19_s16 }
   0x4   :  { %22 = dma.hbm_to_vmem [thread:$0]  %s18_s14, 256, %s20_s16, [#allocation3]  }
   0x5   :  { %710 = dma.done.wait [#allocation3], 256  }
   0x6   :  { %711 = vsyncadd [#allocation3], 4294967040  ;;  %v717_v0 = vmov 2.0   ;;  %v744_v2 = vld [vmem:[#allocation2] sm:$0xff]  ;;  %v746_v3 = vld [vmem:[#allocation2 + $0x8] sm:$0xff]  ;;  %vm1137_vm0 = vcmask 1041408  }
   0x7   :  { %580 = vrcp.f32 %v717_v0  ;;  %31 = vst [vmem:[#allocation1] ss:$4 sm:$0xff] %v744_v2  ;;  %vm1135_vm2 = vcmask 1045508   ;;  %vm1134_vm3 = vcmask 1043456   ;;  %vm466_vm4 = vcmask 1040384   ;;  %s718_s0 = smov [#allocation5]  }
   0x8   :  { %33 = vst [vmem:[#allocation1 + $0x20] ss:$4 sm:$0xff] %v746_v3  ;;  %vm468_vm5 = vcmask 1042434   ;;  %vm1138_vm6 = vcmask 1044484   ;;  %vm1136_vm7 = vcmask 1046534   ;;  %s532_s17 = sshll.u32 %s718_s0, 4  ;;  %s533_s17 = int_to_ptr.vmem [resolvable:$true] %s532_s17 }
   0x9   :  { %s534_s20 = sshll.u32 %s1131_s1, 4  ;;  %s719_s1 = smov [#allocation6]   ;;  %s535_s20 = int_to_ptr.hbm [resolvable:$true] %s534_s20 }
   0xa   :  { %s937_s21 = sshll.u32 %s719_s1, 4  ;;  %s545_s24 = sshll.u32 %s1132_s2, 4  ;;  %s544_s21 = int_to_ptr.vmem [resolvable:$true] %s937_s21  ;;  %s546_s24 = int_to_ptr.hbm [resolvable:$true] %s545_s24 }
   0xb   :  { %s720_s2 = smov [#allocation8]   ;;  %s556_s28 = sshll.u32 %s1133_s3, 4  ;;  %s557_s28 = int_to_ptr.hbm [resolvable:$true] %s556_s28 }
   0xc   :  { %s554_s25 = sshll.u32 %s720_s2, 4  ;;  %s555_s25 = int_to_ptr.vmem [resolvable:$true] %s554_s25 }
   0xd   :  { %v581_v1 = vpop.eup %580 }
   0xe   :  { %v108_v4 = vmul.f32 2.0, %v581_v1  ;;  %v34_v7 = vld.sshfl [vmem:[#allocation1] sm:$0xff pattern:$0x73625140]  ;;  %vm112_vm1 = vweird.f32 %v581_v1 }
   0xf   :  { %v35_v8 = vld.sshfl [vmem:[#allocation1 + $0x8] sm:$0xff pattern:$0x73625140]  ;;  %v36_v10 = vld.sshfl [vmem:[#allocation1 + $0x10] sm:$0xff pattern:$0x73625140] }
  0x10   :  { %v109_v5 = vsub.f32 1.0, %v108_v4  ;;  %v37_v11 = vld.sshfl [vmem:[#allocation1 + $0x18] sm:$0xff pattern:$0x73625140]  ;;  %v51_v12 = vsel %vm1137_vm0, %v34_v7, 0.0  ;;  %v58_v13 = vsel %vm1137_vm0, %v35_v8, 0.0 }
  0x11   :  { %v65_v14 = vsel %vm1137_vm0, %v36_v10, 0.0  ;;  %v72_v15 = vsel %vm1137_vm0, %v37_v11, 0.0  ;;  %v52_v16 = vrot.slane %v51_v12, 4  ;;  %v59_v17 = vrot.slane %v58_v13, 4 }
  0x12   :  { %v110_v6 = vmul.f32 %v581_v1, %v109_v5  ;;  %v66_v18 = vrot.slane %v65_v14, 4  ;;  %v73_v19 = vrot.slane %v72_v15, 4  ;;  %v38_v21 = vld.sshfl [vmem:[#allocation1 + $0x20] sm:$0xff pattern:$0x73625140] }
  0x13   :  { %v39_v22 = vld.sshfl [vmem:[#allocation1 + $0x28] sm:$0xff pattern:$0x73625140]  ;;  %v53_v23 = vadd.f32 %v52_v16, %v51_v12  ;;  %v60_v24 = vadd.f32 %v59_v17, %v58_v13  ;;  %v40_v27 = vld.sshfl [vmem:[#allocation1 + $0x30] sm:$0xff pattern:$0x73625140] }
  0x14   :  { %v111_v9 = vadd.f32 %v581_v1, %v110_v6  ;;  %v67_v25 = vadd.f32 %v66_v18, %v65_v14  ;;  %v74_v26 = vadd.f32 %v73_v19, %v72_v15  ;;  %v41_v28 = vld.sshfl [vmem:[#allocation1 + $0x38] sm:$0xff pattern:$0x73625140]  ;;  %v79_v29 = vsel %vm1137_vm0, %v38_v21, 0.0 }
  0x15   :  { %v86_v30 = vsel %vm1137_vm0, %v39_v22, 0.0  ;;  %v93_v31 = vsel %vm1137_vm0, %v40_v27, 0.0  ;;  %v100_v32 = vsel %vm1137_vm0, %v41_v28, 0.0  ;;  %v54_v33 = vrot.slane %v53_v23, 2 }
  0x16   :  { %v754_v20 = vsel %vm112_vm1, %v581_v1, %v111_v9  ;;  %v61_v34 = vrot.slane %v60_v24, 2  ;;  %v68_v35 = vrot.slane %v67_v25, 2  ;;  %v75_v36 = vrot.slane %v74_v26, 2 }
  0x17   :  { %v80_v37 = vrot.slane %v79_v29, 4  ;;  %v87_v38 = vrot.slane %v86_v30, 4  ;;  %v94_v39 = vrot.slane %v93_v31, 4  ;;  %v101_v40 = vrot.slane %v100_v32, 4 }
  0x18   :  { %v55_v41 = vadd.f32 %v54_v33, %v53_v23  ;;  %v62_v42 = vadd.f32 %v61_v34, %v60_v24  ;;  %v69_v43 = vadd.f32 %v68_v35, %v67_v25  ;;  %v76_v44 = vadd.f32 %v75_v36, %v74_v26 }
  0x19   :  { %v81_v45 = vadd.f32 %v80_v37, %v79_v29  ;;  %v88_v46 = vadd.f32 %v87_v38, %v86_v30  ;;  %v95_v47 = vadd.f32 %v94_v39, %v93_v31  ;;  %v102_v48 = vadd.f32 %v101_v40, %v100_v32 }
  0x1a   :  { %v56_v49 = vrot.slane %v55_v41, 1  ;;  %v63_v50 = vrot.slane %v62_v42, 1  ;;  %v70_v51 = vrot.slane %v69_v43, 1  ;;  %v77_v52 = vrot.slane %v76_v44, 1 }
  0x1b   :  { %v82_v53 = vrot.slane %v81_v45, 2  ;;  %v89_v54 = vrot.slane %v88_v46, 2  ;;  %v96_v55 = vrot.slane %v95_v47, 2  ;;  %v103_v56 = vrot.slane %v102_v48, 2 }
  0x1c   :  { %v57_v57 = vadd.f32 %v56_v49, %v55_v41  ;;  %v64_v58 = vadd.f32 %v63_v50, %v62_v42  ;;  %v71_v59 = vadd.f32 %v70_v51, %v69_v43  ;;  %v78_v60 = vadd.f32 %v77_v52, %v76_v44 }
  0x1d   :  { %v83_v61 = vadd.f32 %v82_v53, %v81_v45  ;;  %v90_v62 = vadd.f32 %v89_v54, %v88_v46  ;;  %v97_v63 = vadd.f32 %v96_v55, %v95_v47  ;;  %v104_v0 = vadd.f32 %v103_v56, %v102_v48 }
  0x1e   :  { %v114_v1 = vmul.f32 %v754_v20, %v57_v57  ;;  %v115_v4 = vmul.f32 %v754_v20, %v64_v58  ;;  %v116_v5 = vmul.f32 %v754_v20, %v71_v59  ;;  %v117_v6 = vmul.f32 %v754_v20, %v78_v60 }
  0x1f   :  { %v84_v7 = vrot.slane %v83_v61, 1  ;;  %v91_v8 = vrot.slane %v90_v62, 1  ;;  %v98_v9 = vrot.slane %v97_v63, 1  ;;  %v105_v10 = vrot.slane %v104_v0, 1 }
  0x20   :  { %v130_v11 = vrot.slane %v115_v4, 6  ;;  %v131_v12 = vrot.slane %v116_v5, 4  ;;  %v132_v13 = vrot.slane %v117_v6, 2  ;;  %v459_v14 = vrot.slane %v115_v4, 7 }
  0x21   :  { %v85_v15 = vadd.f32 %v84_v7, %v83_v61  ;;  %v92_v16 = vadd.f32 %v91_v8, %v90_v62  ;;  %v99_v17 = vadd.f32 %v98_v9, %v97_v63  ;;  %v106_v18 = vadd.f32 %v105_v10, %v104_v0 }
  0x22   :  { %v136_v19 = vsel %vm1137_vm0, %v114_v1, %v130_v11  ;;  %v138_v21 = vsel %vm1135_vm2, %v131_v12, %v132_v13  ;;  %v460_v22 = vrot.slane %v116_v5, 6  ;;  %v461_v23 = vrot.slane %v117_v6, 5 }
  0x23   :  { %v140_v24 = vsel %vm1134_vm3, %v136_v19, %v138_v21  ;;  %v118_v25 = vmul.f32 %v754_v20, %v85_v15  ;;  %v119_v26 = vmul.f32 %v754_v20, %v92_v16  ;;  %v120_v27 = vmul.f32 %v754_v20, %v99_v17 }
  0x24   :  { %v146_v28 = vsub.f32 %v744_v2, %v140_v24  ;;  %v121_v29 = vmul.f32 %v754_v20, %v106_v18  ;;  %v467_v30 = vsel %vm466_vm4, %v114_v1, %v459_v14  ;;  %v469_v31 = vsel %vm468_vm5, %v460_v22, %v461_v23 }
  0x25   :  { %v133_v32 = vrot.slane %v119_v26, 6  ;;  %v134_v33 = vrot.slane %v120_v27, 4  ;;  %v462_v34 = vrot.slane %v118_v25, 4  ;;  %v463_v35 = vrot.slane %v119_v26, 3 }
  0x26   :  { %v148_v36 = vmul.f32 %v146_v28, %v146_v28  ;;  %v135_v37 = vrot.slane %v121_v29, 2  ;;  %v464_v38 = vrot.slane %v120_v27, 2  ;;  %v465_v39 = vrot.slane %v121_v29, 1 }
  0x27   :  { %v141_v2 = vsel %vm1137_vm0, %v118_v25, %v133_v32  ;;  %v470_v20 = vsel %vm1137_vm0, %v467_v30, %v469_v31  ;;  %v472_v40 = vsel %vm1138_vm6, %v462_v34, %v463_v35 }
  0x28   :  { %152 = vst [vmem:[#allocation1] ss:$4 sm:$0xff] %v148_v36  ;;  %v142_v41 = vsel %vm1135_vm2, %v134_v33, %v135_v37  ;;  %v474_v42 = vsel %vm1136_vm7, %v464_v38, %v465_v39 }
  0x29   :  { %v143_v43 = vsel %vm1134_vm3, %v141_v2, %v142_v41  ;;  %v475_v44 = vsel %vm1135_vm2, %v472_v40, %v474_v42 }
  0x2a   :  { %v147_v45 = vsub.f32 %v746_v3, %v143_v43  ;;  %v476_v46 = vsel %vm1134_vm3, %v470_v20, %v475_v44 }
  0x2b   :  { %478 = vst [vmem:[#allocation5] sm:$0xff] %v476_v46 }
  0x2c   :  { %v149_v47 = vmul.f32 %v147_v45, %v147_v45  ;;  %537 = dma.vmem_to_hbm [thread:$0]  %s533_s17, 128, %s535_s20, [#allocation4]  }
  0x2e   :  { %154 = vst [vmem:[#allocation1 + $0x20] ss:$4 sm:$0xff] %v149_v47 }
  0x2f   :  { %v155_v48 = vld.sshfl [vmem:[#allocation1] sm:$0xff pattern:$0x73625140]  ;;  %v156_v49 = vld.sshfl [vmem:[#allocation1 + $0x8] sm:$0xff pattern:$0x73625140] }
  0x30   :  { %v157_v50 = vld.sshfl [vmem:[#allocation1 + $0x10] sm:$0xff pattern:$0x73625140]  ;;  %v158_v51 = vld.sshfl [vmem:[#allocation1 + $0x18] sm:$0xff pattern:$0x73625140] }
  0x31   :  { %v171_v52 = vsel %vm1137_vm0, %v155_v48, 0.0  ;;  %v178_v53 = vsel %vm1137_vm0, %v156_v49, 0.0  ;;  %v185_v54 = vsel %vm1137_vm0, %v157_v50, 0.0  ;;  %v192_v55 = vsel %vm1137_vm0, %v158_v51, 0.0 }
  0x32   :  { %v172_v56 = vrot.slane %v171_v52, 4  ;;  %v179_v3 = vrot.slane %v178_v53, 4  ;;  %v186_v57 = vrot.slane %v185_v54, 4  ;;  %v193_v58 = vrot.slane %v192_v55, 4 }
  0x34   :  { %v173_v59 = vadd.f32 %v172_v56, %v171_v52  ;;  %v180_v60 = vadd.f32 %v179_v3, %v178_v53  ;;  %v187_v61 = vadd.f32 %v186_v57, %v185_v54  ;;  %v194_v62 = vadd.f32 %v193_v58, %v192_v55 }
  0x35   :  { %v159_v63 = vld.sshfl [vmem:[#allocation1 + $0x20] sm:$0xff pattern:$0x73625140]  ;;  %v160_v0 = vld.sshfl [vmem:[#allocation1 + $0x28] sm:$0xff pattern:$0x73625140] }
  0x36   :  { %v161_v1 = vld.sshfl [vmem:[#allocation1 + $0x30] sm:$0xff pattern:$0x73625140]  ;;  %v162_v4 = vld.sshfl [vmem:[#allocation1 + $0x38] sm:$0xff pattern:$0x73625140] }
  0x37   :  { %v174_v5 = vrot.slane %v173_v59, 2  ;;  %v181_v6 = vrot.slane %v180_v60, 2  ;;  %v188_v7 = vrot.slane %v187_v61, 2  ;;  %v195_v8 = vrot.slane %v194_v62, 2 }
  0x38   :  { %v199_v9 = vsel %vm1137_vm0, %v159_v63, 0.0  ;;  %v206_v10 = vsel %vm1137_vm0, %v160_v0, 0.0  ;;  %v213_v11 = vsel %vm1137_vm0, %v161_v1, 0.0  ;;  %v220_v12 = vsel %vm1137_vm0, %v162_v4, 0.0 }
  0x39   :  { %v175_v13 = vadd.f32 %v174_v5, %v173_v59  ;;  %v182_v14 = vadd.f32 %v181_v6, %v180_v60  ;;  %v189_v15 = vadd.f32 %v188_v7, %v187_v61  ;;  %v196_v16 = vadd.f32 %v195_v8, %v194_v62 }
  0x3a   :  { %v200_v17 = vrot.slane %v199_v9, 4  ;;  %v207_v18 = vrot.slane %v206_v10, 4  ;;  %v214_v19 = vrot.slane %v213_v11, 4  ;;  %v221_v21 = vrot.slane %v220_v12, 4 }
  0x3b   :  { %v176_v22 = vrot.slane %v175_v13, 1  ;;  %v183_v23 = vrot.slane %v182_v14, 1  ;;  %v190_v24 = vrot.slane %v189_v15, 1  ;;  %v197_v25 = vrot.slane %v196_v16, 1 }
  0x3c   :  { %v201_v26 = vadd.f32 %v200_v17, %v199_v9  ;;  %v208_v27 = vadd.f32 %v207_v18, %v206_v10  ;;  %v215_v28 = vadd.f32 %v214_v19, %v213_v11  ;;  %v222_v29 = vadd.f32 %v221_v21, %v220_v12 }
  0x3d   :  { %v177_v30 = vadd.f32 %v176_v22, %v175_v13  ;;  %v184_v31 = vadd.f32 %v183_v23, %v182_v14  ;;  %v191_v32 = vadd.f32 %v190_v24, %v189_v15  ;;  %v198_v37 = vadd.f32 %v197_v25, %v196_v16 }
  0x3e   :  { %v202_v33 = vrot.slane %v201_v26, 2  ;;  %v209_v34 = vrot.slane %v208_v27, 2  ;;  %v216_v35 = vrot.slane %v215_v28, 2  ;;  %v223_v36 = vrot.slane %v222_v29, 2 }
  0x3f   :  { %v794_v38 = vmul.f32 0.5, %v177_v30  ;;  %v796_v39 = vmul.f32 0.5, %v184_v31  ;;  %v798_v42 = vmul.f32 0.5, %v191_v32  ;;  %v801_v47 = vmul.f32 0.5, %v198_v37 }
  0x40   :  { %v203_v2 = vadd.f32 %v202_v33, %v201_v26  ;;  %v210_v20 = vadd.f32 %v209_v34, %v208_v27  ;;  %v217_v40 = vadd.f32 %v216_v35, %v215_v28  ;;  %v224_v41 = vadd.f32 %v223_v36, %v222_v29 }
  0x41   :  { %582 = vrsqrt.f32 %v794_v38  ;;  %vm242_vm8 = vcmp.eq.f32.partialorder %v794_v38, inf  ;;  %vm244_vm9 = vcmp.eq.f32.partialorder %v794_v38, 0.0  ;;  %v245_v1 = vand.u32 2147483648, %v794_v38 }
  0x42   :  { %v204_v43 = vrot.slane %v203_v2, 1  ;;  %v211_v44 = vrot.slane %v210_v20, 1  ;;  %v218_v45 = vrot.slane %v217_v40, 1  ;;  %v225_v46 = vrot.slane %v224_v41, 1 }
  0x43   :  { %584 = vrsqrt.f32 %v796_v39  ;;  %vm254_vm10 = vcmp.eq.f32.partialorder %v796_v39, inf  ;;  %v257_v4 = vand.u32 2147483648, %v796_v39  ;;  %v269_v5 = vand.u32 2147483648, %v798_v42 }
  0x44   :  { %v205_v48 = vadd.f32 %v204_v43, %v203_v2  ;;  %v212_v49 = vadd.f32 %v211_v44, %v210_v20  ;;  %v219_v50 = vadd.f32 %v218_v45, %v217_v40  ;;  %v226_v51 = vadd.f32 %v225_v46, %v224_v41 }
  0x45   :  { %586 = vrsqrt.f32 %v798_v42  ;;  %vm256_vm11 = vcmp.eq.f32.partialorder %v796_v39, 0.0  ;;  %vm266_vm12 = vcmp.eq.f32.partialorder %v798_v42, inf  ;;  %v281_v12 = vand.u32 2147483648, %v801_v47 }
  0x46   :  { %v805_v52 = vmul.f32 0.5, %v205_v48  ;;  %v807_v53 = vmul.f32 0.5, %v212_v49  ;;  %v809_v54 = vmul.f32 0.5, %v219_v50  ;;  %v811_v56 = vmul.f32 0.5, %v226_v51 }
  0x47   :  { %v583_v55 = vpop.eup %582  ;;  %588 = vrsqrt.f32 %v801_v47  ;;  %vm268_vm13 = vcmp.eq.f32.partialorder %v798_v42, 0.0  ;;  %vm278_vm14 = vcmp.eq.f32.partialorder %v801_v47, inf  ;;  %vm280_vm15 = vcmp.eq.f32.partialorder %v801_v47, 0.0 }
  0x48   :  { %v236_v3 = vmul.f32 %v583_v55, %v794_v38  ;;  %590 = vrsqrt.f32 %v805_v52  ;;  %v293_v14 = vand.u32 2147483648, %v805_v52  ;;  %v305_v15 = vand.u32 2147483648, %v807_v53 }
  0x49   :  { %v585_v57 = vpop.eup %584  ;;  %592 = vrsqrt.f32 %v807_v53  ;;  %v317_v26 = vand.u32 2147483648, %v809_v54  ;;  %vm290_vm1 = vcmp.eq.f32.partialorder %v805_v52, inf  ;;  %vm292_vm3 = vcmp.eq.f32.partialorder %v805_v52, 0.0 }
  0x4a   :  { %v237_v58 = vmul.f32 %v583_v55, %v236_v3  ;;  %v248_v59 = vmul.f32 %v585_v57, %v796_v39  ;;  %594 = vrsqrt.f32 %v809_v54  ;;  %vm302_vm2 = vcmp.eq.f32.partialorder %v807_v53, inf }
  0x4b   :  { %v587_v60 = vpop.eup %586  ;;  %596 = vrsqrt.f32 %v811_v56  ;;  %vm314_vm7 = vcmp.eq.f32.partialorder %v809_v54, inf  ;;  %vm304_vm0 = vcmp.eq.f32.partialorder %v807_v53, 0.0  ;;  %vm316_vm6 = vcmp.eq.f32.partialorder %v809_v54, 0.0 }
  0x4c   :  { %v238_v61 = vmul.f32 0.5, %v237_v58  ;;  %v249_v62 = vmul.f32 %v585_v57, %v248_v59  ;;  %v260_v63 = vmul.f32 %v587_v60, %v798_v42 }
  0x4d   :  { %v589_v0 = vpop.eup %588 }
  0x4e   :  { %v591_v6 = vpop.eup %590  ;;  %v239_v7 = vsub.f32 1.5, %v238_v61  ;;  %v250_v8 = vmul.f32 0.5, %v249_v62  ;;  %v261_v9 = vmul.f32 %v587_v60, %v260_v63  ;;  %v272_v10 = vmul.f32 %v589_v0, %v801_v47 }
  0x4f   :  { %v593_v11 = vpop.eup %592  ;;  %v284_v13 = vmul.f32 %v591_v6, %v805_v52 }
  0x50   :  { %v595_v16 = vpop.eup %594  ;;  %v240_v17 = vmul.f32 %v583_v55, %v239_v7  ;;  %v251_v18 = vsub.f32 1.5, %v250_v8  ;;  %v262_v19 = vmul.f32 0.5, %v261_v9  ;;  %v273_v21 = vmul.f32 %v589_v0, %v272_v10 }
  0x51   :  { %v597_v22 = vpop.eup %596  ;;  %v285_v23 = vmul.f32 %v591_v6, %v284_v13  ;;  %v296_v24 = vmul.f32 %v593_v11, %v807_v53  ;;  %v308_v25 = vmul.f32 %v595_v16, %v809_v54 }
  0x52   :  { %v241_v27 = vmul.f32 %v240_v17, %v794_v38  ;;  %v252_v28 = vmul.f32 %v585_v57, %v251_v18  ;;  %v263_v29 = vsub.f32 1.5, %v262_v19  ;;  %v274_v30 = vmul.f32 0.5, %v273_v21 }
  0x53   :  { %v286_v31 = vmul.f32 0.5, %v285_v23  ;;  %v297_v32 = vmul.f32 %v593_v11, %v296_v24  ;;  %v309_v33 = vmul.f32 %v595_v16, %v308_v25  ;;  %v320_v34 = vmul.f32 %v597_v22, %v811_v56 }
  0x54   :  { %v243_v35 = vsel %vm242_vm8, %v794_v38, %v241_v27  ;;  %v253_v36 = vmul.f32 %v252_v28, %v796_v39  ;;  %v264_v37 = vmul.f32 %v587_v60, %v263_v29  ;;  %v275_v2 = vsub.f32 1.5, %v274_v30 }
  0x55   :  { %v246_v20 = vsel %vm244_vm9, %v245_v1, %v243_v35  ;;  %v287_v40 = vsub.f32 1.5, %v286_v31  ;;  %v298_v41 = vmul.f32 0.5, %v297_v32  ;;  %v310_v43 = vmul.f32 0.5, %v309_v33 }
  0x56   :  { %v255_v44 = vsel %vm254_vm10, %v796_v39, %v253_v36  ;;  %v265_v45 = vmul.f32 %v264_v37, %v798_v42  ;;  %v276_v46 = vmul.f32 %v589_v0, %v275_v2  ;;  %v321_v48 = vmul.f32 %v597_v22, %v320_v34 }
  0x57   :  { %v258_v49 = vsel %vm256_vm11, %v257_v4, %v255_v44  ;;  %v288_v38 = vmul.f32 %v591_v6, %v287_v40  ;;  %v299_v50 = vsub.f32 1.5, %v298_v41  ;;  %v311_v51 = vsub.f32 1.5, %v310_v43 }
  0x58   :  { %vm326_vm8 = vcmp.eq.f32.partialorder %v811_v56, inf  ;;  %v267_v55 = vsel %vm266_vm12, %v798_v42, %v265_v45  ;;  %v277_v3 = vmul.f32 %v276_v46, %v801_v47  ;;  %v322_v57 = vmul.f32 0.5, %v321_v48 }
  0x59   :  { %v865_v58 = vmax.f32 %v246_v20, 1e-12  ;;  %v270_v59 = vsel %vm268_vm13, %v269_v5, %v267_v55  ;;  %v289_v39 = vmul.f32 %v288_v38, %v805_v52  ;;  %v300_v60 = vmul.f32 %v593_v11, %v299_v50 }
  0x5a   :  { %v312_v61 = vmul.f32 %v595_v16, %v311_v51  ;;  %v279_v62 = vsel %vm278_vm14, %v801_v47, %v277_v3  ;;  %v323_v63 = vsub.f32 1.5, %v322_v57  ;;  %v873_v0 = vmax.f32 %v258_v49, 1e-12 }
  0x5b   :  { %v875_v1 = vmax.f32 %v270_v59, 1e-12  ;;  %v282_v4 = vsel %vm280_vm15, %v281_v12, %v279_v62  ;;  %v291_v42 = vsel %vm290_vm1, %v805_v52, %v289_v39  ;;  %v301_v5 = vmul.f32 %v300_v60, %v807_v53 }
  0x5c   :  { %v313_v6 = vmul.f32 %v312_v61, %v809_v54  ;;  %v294_v7 = vsel %vm292_vm3, %v293_v14, %v291_v42  ;;  %v324_v8 = vmul.f32 %v597_v22, %v323_v63  ;;  %v888_v9 = vmax.f32 %v282_v4, 1e-12 }
  0x5d   :  { %598 = vrcp.f32 %v865_v58  ;;  %v303_v47 = vsel %vm302_vm2, %v807_v53, %v301_v5  ;;  %v897_v11 = vmax.f32 %v294_v7, 1e-12  ;;  %vm328_vm2 = vcmp.eq.f32.partialorder %v811_v56, 0.0 }
  0x5e   :  { %v315_v10 = vsel %vm314_vm7, %v809_v54, %v313_v6  ;;  %600 = vrcp.f32 %v873_v0  ;;  %v306_v52 = vsel %vm304_vm0, %v305_v15, %v303_v47  ;;  %v325_v13 = vmul.f32 %v324_v8, %v811_v56 }
  0x5f   :  { %v318_v12 = vsel %vm316_vm6, %v317_v26, %v315_v10  ;;  %v329_v14 = vand.u32 2147483648, %v811_v56  ;;  %v909_v16 = vmax.f32 %v306_v52, 1e-12  ;;  %v487_v18 = vrot.slane %v873_v0, 7 }
  0x60   :  { %v911_v17 = vmax.f32 %v318_v12, 1e-12  ;;  %v327_v53 = vsel %vm326_vm8, %v811_v56, %v325_v13  ;;  %602 = vrcp.f32 %v875_v1  ;;  %v488_v54 = vrot.slane %v875_v1, 6 }
  0x61   :  { %v489_v15 = vrot.slane %v888_v9, 5  ;;  %v330_v19 = vsel %vm328_vm2, %v329_v14, %v327_v53  ;;  %v490_v21 = vrot.slane %v897_v11, 4  ;;  %v491_v22 = vrot.slane %v909_v16, 3 }
  0x62   :  { %v924_v24 = vmax.f32 %v330_v19, 1e-12  ;;  %604 = vrcp.f32 %v888_v9  ;;  %v492_v25 = vrot.slane %v911_v17, 2  ;;  %v494_v56 = vsel %vm466_vm4, %v865_v58, %v487_v18 }
  0x63   :  { %v922_v23 = vpop.eup %598  ;;  %v495_v27 = vsel %vm468_vm5, %v488_v54, %v489_v15  ;;  %vm1139_vm0 = vcmask 1044484   ;;  %606 = vrcp.f32 %v897_v11  ;;  %vm1140_vm3 = vcmask 1041408  }
  0x64   :  { %v930_v26 = vpop.eup %600  ;;  %v340_v28 = vmul.f32 %v922_v23, %v865_v58  ;;  %v493_v29 = vrot.slane %v924_v24, 1  ;;  %v497_v30 = vsel %vm1139_vm0, %v490_v21, %v491_v22  ;;  %v496_v31 = vsel %vm1140_vm3, %v494_v56, %v495_v27 }
  0x65   :  { %v355_v33 = vmul.f32 %v930_v26, %v873_v0  ;;  %608 = vrcp.f32 %v909_v16  ;;  %vm1141_vm6 = vcmask 1046534   ;;  %vm1142_vm7 = vcmask 1045508  }
  0x66   :  { %v341_v32 = vsub.f32 1.0, %v340_v28  ;;  %v946_v34 = vpop.eup %602  ;;  %v498_v35 = vsel %vm1141_vm6, %v492_v25, %v493_v29  ;;  %610 = vrcp.f32 %v911_v17  ;;  %v363_v2 = vand.u32 2147483647, %v873_v0 }
  0x67   :  { %v499_v36 = vsel %vm1142_vm7, %v497_v30, %v498_v35  ;;  %612 = vrcp.f32 %v924_v24  ;;  %vm1143_vm9 = vcmask 1043456   ;;  %vm344_vm10 = vweird.f32 %v865_v58 }
  0x68   :  { %v342_v37 = vmul.f32 %v922_v23, %v341_v32  ;;  %v955_v20 = vpop.eup %604  ;;  %v500_v40 = vsel %vm1143_vm9, %v496_v31, %v499_v36  ;;  %v356_v41 = vsub.f32 1.0, %v355_v33  ;;  %vm345_vm11 = vweird.f32 %v922_v23 }
  0x69   :  { %502 = vst [vmem:[#allocation6] sm:$0xff] %v500_v40  ;;  %v348_v43 = vand.u32 2147483647, %v865_v58  ;;  %v365_v44 = vand.u32 2147483648, %v873_v0  ;;  %v370_v45 = vmul.f32 %v946_v34, %v875_v1  ;;  %v350_v48 = vand.u32 2147483648, %v865_v58  ;;  %v971_v38 = vpop.eup %606  ;;  %vm992_vm1 = vmor %vm344_vm10, %vm345_vm11 }
  0x6a   :  { %v966_v46 = vadd.f32 %v922_v23, %v342_v37  ;;  %v357_v49 = vmul.f32 %v930_v26, %v356_v41  ;;  %vm359_vm12 = vweird.f32 %v873_v0  ;;  %548 = dma.vmem_to_hbm [thread:$0]  %s544_s21, 128, %s546_s24, [#allocation7]   ;;  %vm360_vm13 = vweird.f32 %v930_v26 }
  0x6b   :  { %vm974_vm14 = vcmp.eq.f32.partialorder %v363_v2, 8.507059e+37  ;;  %v371_v51 = vsub.f32 1.0, %v370_v45  ;;  %v385_v55 = vmul.f32 %v955_v20, %v888_v9  ;;  %v980_v3 = vpop.eup %608  ;;  %vm374_vm15 = vweird.f32 %v875_v1  ;;  %vm1008_vm2 = vmor %vm359_vm12, %vm360_vm13 }
  0x6c   :  { %v358_v57 = vadd.f32 %v930_v26, %v357_v49  ;;  %v378_v59 = vand.u32 2147483647, %v875_v1  ;;  %v380_v39 = vand.u32 2147483648, %v875_v1  ;;  %v986_v60 = vpop.eup %610  ;;  %v366_v62 = vor.u32 1.1754944e-38, %v365_v44 }
  0x6d   :  { %v372_v63 = vmul.f32 %v946_v34, %v371_v51  ;;  %vm375_vm8 = vweird.f32 %v946_v34  ;;  %v386_v4 = vsub.f32 1.0, %v385_v55  ;;  %v998_v42 = vpop.eup %612  ;;  %v347_v5 = vsel %vm992_vm1, %v922_v23, %v966_v46 }
  0x6e   :  { %vm389_vm0 = vweird.f32 %v888_v9  ;;  %vm390_vm3 = vweird.f32 %v955_v20  ;;  %v400_v7 = vmul.f32 %v971_v38, %v897_v11  ;;  %v362_v8 = vsel %vm1008_vm2, %v930_v26, %v358_v57  ;;  %vm1024_vm6 = vmor %vm374_vm15, %vm375_vm8 }
  0x6f   :  { %v373_v47 = vadd.f32 %v946_v34, %v372_v63  ;;  %v387_v10 = vmul.f32 %v955_v20, %v386_v4  ;;  %v393_v0 = vand.u32 2147483647, %v888_v9  ;;  %vm1028_vm7 = vcmp.eq.f32.partialorder %v378_v59, 8.507059e+37  ;;  %vm1048_vm10 = vmor %vm389_vm0, %vm390_vm3 }
  0x70   :  { %v381_v13 = vor.u32 1.1754944e-38, %v380_v39  ;;  %v395_v14 = vand.u32 2147483648, %v888_v9  ;;  %v401_v18 = vsub.f32 1.0, %v400_v7  ;;  %vm404_vm9 = vweird.f32 %v897_v11 }
  0x71   :  { %v377_v53 = vsel %vm1024_vm6, %v946_v34, %v373_v47  ;;  %v388_v54 = vadd.f32 %v955_v20, %v387_v10  ;;  %v415_v1 = vmul.f32 %v980_v3, %v909_v16  ;;  %v1042_v15 = vsel %vm974_vm14, %v366_v62, %v362_v8 }
  0x72   :  { %v402_v21 = vmul.f32 %v971_v38, %v401_v18  ;;  %v408_v22 = vand.u32 2147483647, %v897_v11  ;;  %v410_v25 = vand.u32 2147483648, %v897_v11  ;;  %vm394_vm11 = vcmp.eq.f32.partialorder %v393_v0, 8.507059e+37 }
  0x73   :  { %v392_v56 = vsel %vm1048_vm10, %v955_v20, %v388_v54  ;;  %vm405_vm12 = vweird.f32 %v971_v38  ;;  %v416_v26 = vsub.f32 1.0, %v415_v1  ;;  %v382_v9 = vsel %vm1028_vm7, %v381_v13, %v377_v53 }
  0x74   :  { %v396_v27 = vor.u32 1.1754944e-38, %v395_v14  ;;  %v403_v28 = vadd.f32 %v971_v38, %v402_v21  ;;  %v423_v29 = vand.u32 2147483647, %v909_v16  ;;  %vm420_vm13 = vweird.f32 %v980_v3  ;;  %vm1074_vm15 = vmor %vm404_vm9, %vm405_vm12 }
  0x75   :  { %v417_v30 = vmul.f32 %v980_v3, %v416_v26  ;;  %v425_v31 = vand.u32 2147483648, %v909_v16  ;;  %v430_v32 = vmul.f32 %v986_v60, %v911_v17  ;;  %vm1068_vm14 = vcmp.eq.f32.partialorder %v348_v43, 8.507059e+37 }
  0x76   :  { %v397_v34 = vsel %vm394_vm11, %v396_v27, %v392_v56  ;;  %vm1078_vm8 = vcmp.eq.f32.partialorder %v408_v22, 8.507059e+37  ;;  %v411_v37 = vor.u32 1.1754944e-38, %v410_v25  ;;  %vm419_vm2 = vweird.f32 %v909_v16 }
  0x77   :  { %v407_v2 = vsel %vm1074_vm15, %v971_v38, %v403_v28  ;;  %v418_v20 = vadd.f32 %v980_v3, %v417_v30  ;;  %v431_v40 = vsub.f32 1.0, %v430_v32  ;;  %v440_v11 = vand.u32 2147483648, %v911_v17  ;;  %vm421_vm0 = vmor %vm419_vm2, %vm420_vm13 }
  0x78   :  { %vm424_vm3 = vcmp.eq.f32.partialorder %v423_v29, 8.507059e+37  ;;  %vm434_vm6 = vweird.f32 %v911_v17  ;;  %vm435_vm7 = vweird.f32 %v986_v60  ;;  %v445_v41 = vmul.f32 %v998_v42, %v924_v24 }
  0x79   :  { %v422_v16 = vsel %vm421_vm0, %v980_v3, %v418_v20  ;;  %v426_v43 = vor.u32 1.1754944e-38, %v425_v31  ;;  %v432_v44 = vmul.f32 %v986_v60, %v431_v40  ;;  %v438_v45 = vand.u32 2147483647, %v911_v17  ;;  %vm436_vm10 = vmor %vm434_vm6, %vm435_vm7 }
  0x7a   :  { %v412_v49 = vsel %vm1078_vm8, %v411_v37, %v407_v2  ;;  %v441_v38 = vor.u32 1.1754944e-38, %v440_v11  ;;  %v446_v50 = vsub.f32 1.0, %v445_v41  ;;  %vm450_vm9 = vweird.f32 %v998_v42 }
  0x7b   :  { %v427_v51 = vsel %vm424_vm3, %v426_v43, %v422_v16  ;;  %v433_v55 = vadd.f32 %v986_v60, %v432_v44  ;;  %v453_v57 = vand.u32 2147483647, %v924_v24  ;;  %v455_v59 = vand.u32 2147483648, %v924_v24 }
  0x7c   :  { %v447_v3 = vmul.f32 %v998_v42, %v446_v50  ;;  %v511_v39 = vrot.slane %v1042_v15, 7  ;;  %v512_v62 = vrot.slane %v382_v9, 6  ;;  %v513_v63 = vrot.slane %v397_v34, 5 }
  0x7d   :  { %v351_v4 = vor.u32 1.1754944e-38, %v350_v48  ;;  %v437_v6 = vsel %vm436_vm10, %v986_v60, %v433_v55  ;;  %vm439_vm11 = vcmp.eq.f32.partialorder %v438_v45, 8.507059e+37  ;;  %vm449_vm12 = vweird.f32 %v924_v24 }
  0x7e   :  { %v442_v7 = vsel %vm439_vm11, %v441_v38, %v437_v6  ;;  %v448_v8 = vadd.f32 %v998_v42, %v447_v3  ;;  %v514_v47 = vrot.slane %v412_v49, 4  ;;  %v515_v17 = vrot.slane %v427_v51, 3  ;;  %vm451_vm13 = vmor %vm449_vm12, %vm450_vm9 }
  0x7f   :  { %v352_v10 = vsel %vm1068_vm14, %v351_v4, %v347_v5  ;;  %vm454_vm15 = vcmp.eq.f32.partialorder %v453_v57, 8.507059e+37  ;;  %v456_v58 = vor.u32 1.1754944e-38, %v455_v59  ;;  %v516_v48 = vrot.slane %v442_v7, 2 }
  0x80   :  { %v452_v24 = vsel %vm451_vm13, %v998_v42, %v448_v8  ;;  %v518_v60 = vsel %vm466_vm4, %v352_v10, %v511_v39  ;;  %v519_v0 = vsel %vm468_vm5, %v512_v62, %v513_v63  ;;  %vm1162_vm8 = vcmask 1044484  }
  0x81   :  { %v457_v52 = vsel %vm454_vm15, %v456_v58, %v452_v24  ;;  %v521_v12 = vsel %vm1162_vm8, %v514_v47, %v515_v17  ;;  %vm1163_vm1 = vcmask 1041408   ;;  %vm1164_vm14 = vcmask 1046534  }
  0x82   :  { %v517_v61 = vrot.slane %v457_v52, 1  ;;  %v520_v23 = vsel %vm1163_vm1, %v518_v60, %v519_v0  ;;  %vm1165_vm2 = vcmask 1045508   ;;  %vm1166_vm4 = vcmask 1043456  }
  0x84   :  { %v522_v46 = vsel %vm1164_vm14, %v516_v48, %v517_v61 }
  0x85   :  { %v523_v42 = vsel %vm1165_vm2, %v521_v12, %v522_v46 }
  0x86   :  { %v524_v5 = vsel %vm1166_vm4, %v520_v23, %v523_v42 }
  0x87   :  { %526 = vst [vmem:[#allocation8] sm:$0xff] %v524_v5 }
  0x88   :  { %559 = dma.vmem_to_hbm [thread:$0]  %s555_s25, 128, %s557_s28, [#allocation7]  }
  0x89   :  { %712 = dma.done.wait [#allocation4], 128  }
  0x8a   :  { %713 = vsyncadd [#allocation4], 4294967168 }
  0x8b   :  { %714 = dma.done.wait [#allocation7], 256  }
  0x8c   :  { %715 = vsyncadd [#allocation7], 4294967040 }
  0x8d   :  { %572 = vsyncpa [#allocation3], 1 }
  0x8e   :  { %573 = vsyncpa [#allocation4], 1 }
  0x8f   :  { %574 = vsyncpa [#allocation7], 1 }

</bundles_post_ra>
